<compile_context>
chip_gen: v5e
topology: v5e:2x2
jax: 0.10.0
libtpu: 0.0.40
codegen_flags: <defaults>
</compile_context>

<pallas_src>
import math

import jax
import jax.numpy as jnp
from jax.experimental import pallas as pl
from jax.experimental.pallas import tpu as pltpu


def _round_up(x: int, m: int) -> int:
    return ((x + m - 1) // m) * m


def _matmul_bias_kernel(a_ref, b_ref, bias_ref, o_ref, acc_ref):
    k = pl.program_id(2)

    @pl.when(k == 0)
    def _():
        acc_ref[...] = jnp.zeros_like(acc_ref)

    acc_ref[...] += jnp.dot(a_ref[...], b_ref[...],
                            preferred_element_type=jnp.float32)

    @pl.when(k == pl.num_programs(2) - 1)
    def _():
        o_ref[...] = (acc_ref[...] + bias_ref[...]).astype(o_ref.dtype)


def matmul_bias(a, b, bias=None, *, tm=256, tn=512, tk=512):
    """out = a @ b (+ bias), via a tiled Pallas MXU kernel.

    a: [M, K] f32, b: [K, N] f32, bias: [N] f32 or None.  Arbitrary shapes:
    everything is zero-padded up to tile multiples and sliced back.
    """
    M, K = a.shape
    K2, N = b.shape
    assert K == K2, "inner dimensions must match"

    # Clamp tiles for small problems; keep (8, 128) divisibility.
    tm = min(tm, _round_up(M, 8))
    tk = min(tk, _round_up(K, 128))
    tn = min(tn, _round_up(N, 128))

    Mp, Kp, Np = _round_up(M, tm), _round_up(K, tk), _round_up(N, tn)

    a_p = jnp.pad(a.astype(jnp.float32), ((0, Mp - M), (0, Kp - K)))
    b_p = jnp.pad(b.astype(jnp.float32), ((0, Kp - K), (0, Np - N)))
    if bias is None:
        bias_p = jnp.zeros((1, Np), jnp.float32)
    else:
        bias_p = jnp.pad(bias.astype(jnp.float32), (0, Np - N)).reshape(1, Np)

    grid = (Mp // tm, Np // tn, Kp // tk)

    cost = pl.CostEstimate(
        flops=int(2 * Mp * Np * Kp),
        transcendentals=0,
        bytes_accessed=int(4 * (Mp * Kp + Kp * Np + Mp * Np + Np)),
    )

    out_p = pl.pallas_call(
        _matmul_bias_kernel,
        out_shape=jax.ShapeDtypeStruct((Mp, Np), jnp.float32),
        grid_spec=pltpu.PrefetchScalarGridSpec(
            num_scalar_prefetch=0,
            grid=grid,
            in_specs=[
                pl.BlockSpec((tm, tk), lambda i, j, k: (i, k)),
                pl.BlockSpec((tk, tn), lambda i, j, k: (k, j)),
                pl.BlockSpec((1, tn), lambda i, j, k: (0, j)),
            ],
            out_specs=pl.BlockSpec((tm, tn), lambda i, j, k: (i, j)),
            scratch_shapes=[pltpu.VMEM((tm, tn), jnp.float32)],
        ),
        compiler_params=pltpu.CompilerParams(
            dimension_semantics=("parallel", "parallel", "arbitrary")),
        cost_estimate=cost,
    )(a_p, b_p, bias_p)

    return out_p[:M, :N]


def graph_convolution_forward(x, adj_indices, adj_rel, num_nodes,
                              weight, alpha_weight, bias):
    """GraphConvolution.forward(input, adj) with adj = (indices, rel, N)."""
    # alpha(adj[1]).t()[0]  -- embedding gather (plain JAX glue).
    alp = alpha_weight[adj_rel][:, 0]                              # [E]

    # Dense adjacency from COO (duplicate indices sum, matching
    # torch.sparse_coo_tensor), then symmetrize:  A = A + A^T.
    rows, cols = adj_indices[0], adj_indices[1]
    A = jnp.zeros((num_nodes, num_nodes), jnp.float32).at[rows, cols].add(alp)
    A = A + A.T

    # support = input @ weight                (Pallas tiled matmul)
    support = matmul_bias(x, weight)
    # output  = A @ support + bias            (Pallas tiled matmul, fused bias)
    return matmul_bias(A, support, bias)


if __name__ == "__main__":
    num_nodes = 64
    in_features = 32
    out_features = 32
    num_relations = 4
    num_edges = 128

    key = jax.random.PRNGKey(0)
    kx, kw, ka, kb, ki, kj, kr = jax.random.split(key, 7)

    stdv = 1.0 / math.sqrt(out_features)
    x = jax.random.normal(kx, (num_nodes, in_features), dtype=jnp.float32)
    weight = jax.random.uniform(kw, (in_features, out_features),
                                minval=-stdv, maxval=stdv, dtype=jnp.float32)
    bias = jax.random.uniform(kb, (out_features,),
                              minval=-stdv, maxval=stdv, dtype=jnp.float32)
    # nn.Embedding(num_relations + 1, 1, padding_idx=0): N(0,1), row 0 zeroed.
    alpha_weight = jax.random.normal(
        ka, (num_relations + 1, 1), dtype=jnp.float32).at[0].set(0.0)

    rows = jax.random.randint(ki, (num_edges,), 0, num_nodes, dtype=jnp.int32)
    cols = jax.random.randint(kj, (num_edges,), 0, num_nodes, dtype=jnp.int32)
    adj_indices = jnp.stack([rows, cols])                      # adj[0]  [2, E]
    adj_rel = jax.random.randint(kr, (num_edges,), 1, num_relations + 1,
                                 dtype=jnp.int32)              # adj[1]  [E]

    out = graph_convolution_forward(x, adj_indices, adj_rel, num_nodes,
                                    weight, alpha_weight, bias)
    jax.block_until_ready(out)

    # Plain-JAX reference check.
    alp_ref = alpha_weight[adj_rel][:, 0]
    A_ref = jnp.zeros((num_nodes, num_nodes),
                      jnp.float32).at[rows, cols].add(alp_ref)
    A_ref = A_ref + A_ref.T
    ref = A_ref @ (x @ weight) + bias

    assert out.shape == (num_nodes, out_features)
    assert jnp.allclose(out, ref, atol=1e-4, rtol=1e-4)

    print("KERNEL_OK")
</pallas_src>

<mosaic_0001>
module attributes {stable_mosaic.version = 11 : i64} {
  func.func @_matmul_bias_kernel(%arg0: i32, %arg1: i32, %arg2: i32, %arg3: memref<64x128xf32, #tpu.memory_space<vmem>>, %arg4: memref<128x128xf32, #tpu.memory_space<vmem>>, %arg5: memref<1x128xf32, #tpu.memory_space<vmem>>, %arg6: memref<64x128xf32, #tpu.memory_space<vmem>>, %arg7: memref<64x128xf32, #tpu.memory_space<vmem>>) attributes {dimension_semantics = [#tpu.dimension_semantics<parallel>, #tpu.dimension_semantics<parallel>, #tpu.dimension_semantics<arbitrary>], iteration_bounds = array<i64: 1, 1, 1>, scalar_prefetch = 0 : i64, scratch_operands = 1 : i64, tpu.core_type = #tpu.core_type<tc>, window_params = [{transform_indices = @transform_0, window_bounds = array<i64: 64, 128>}, {transform_indices = @transform_1, window_bounds = array<i64: 128, 128>}, {transform_indices = @transform_2, window_bounds = array<i64: 1, 128>}, {transform_indices = @transform_3, window_bounds = array<i64: 64, 128>}]} {
    %c0_i32 = arith.constant 0 : i32
    %0 = arith.cmpi eq, %arg2, %c0_i32 : i32
    %1 = arith.extui %0 : i1 to i32
    %c0_i32_0 = arith.constant 0 : i32
    %2 = arith.cmpi ne, %1, %c0_i32_0 : i32
    scf.if %2 {
      %cst_10 = arith.constant 0.000000e+00 : f32
      %12 = vector.broadcast %cst_10 : f32 to vector<64x128xf32>
      %c0_11 = arith.constant 0 : index
      %c0_12 = arith.constant 0 : index
      %13 = vector.load %arg7[%c0_11, %c0_12] : memref<64x128xf32, #tpu.memory_space<vmem>>, vector<64x128xf32>
      tpu.vector_store %arg7[%c0_11, %c0_12], %12 {strides = array<i32>} : memref<64x128xf32, #tpu.memory_space<vmem>>, vector<64x128xf32>,
    } else {
    }
    %c0 = arith.constant 0 : index
    %c0_1 = arith.constant 0 : index
    %3 = vector.load %arg7[%c0, %c0_1] : memref<64x128xf32, #tpu.memory_space<vmem>>, vector<64x128xf32>
    %c0_2 = arith.constant 0 : index
    %c0_3 = arith.constant 0 : index
    %4 = vector.load %arg3[%c0_2, %c0_3] : memref<64x128xf32, #tpu.memory_space<vmem>>, vector<64x128xf32>
    %c0_4 = arith.constant 0 : index
    %c0_5 = arith.constant 0 : index
    %5 = vector.load %arg4[%c0_4, %c0_5] : memref<128x128xf32, #tpu.memory_space<vmem>>, vector<128x128xf32>
    %cst = arith.constant dense<0.000000e+00> : vector<64x128xf32>
    %6 = tpu.matmul %4, %5, %cst {dimension_numbers = #tpu.dot_dimension_numbers<[1], [0], [0], [1], [0, 0, 1, 1], [], []>} : vector<64x128xf32>, vector<128x128xf32>, vector<64x128xf32> -> vector<64x128xf32>
    %7 = arith.addf %3, %6 : vector<64x128xf32>
    %c0_6 = arith.constant 0 : index
    %c0_7 = arith.constant 0 : index
    %8 = vector.load %arg7[%c0_6, %c0_7] : memref<64x128xf32, #tpu.memory_space<vmem>>, vector<64x128xf32>
    tpu.vector_store %arg7[%c0_6, %c0_7], %7 {strides = array<i32>} : memref<64x128xf32, #tpu.memory_space<vmem>>, vector<64x128xf32>,
    %c0_i32_8 = arith.constant 0 : i32
    %9 = arith.cmpi eq, %arg2, %c0_i32_8 : i32
    %10 = arith.extui %9 : i1 to i32
    %c0_i32_9 = arith.constant 0 : i32
    %11 = arith.cmpi ne, %10, %c0_i32_9 : i32
    scf.if %11 {
      %c0_10 = arith.constant 0 : index
      %c0_11 = arith.constant 0 : index
      %12 = vector.load %arg7[%c0_10, %c0_11] : memref<64x128xf32, #tpu.memory_space<vmem>>, vector<64x128xf32>
      %c0_12 = arith.constant 0 : index
      %c0_13 = arith.constant 0 : index
      %13 = vector.load %arg5[%c0_12, %c0_13] : memref<1x128xf32, #tpu.memory_space<vmem>>, vector<1x128xf32>
      %14 = vector.broadcast %13 : vector<1x128xf32> to vector<64x128xf32>
      %15 = arith.addf %12, %14 : vector<64x128xf32>
      %c0_14 = arith.constant 0 : index
      %c0_15 = arith.constant 0 : index
      %16 = vector.load %arg6[%c0_14, %c0_15] : memref<64x128xf32, #tpu.memory_space<vmem>>, vector<64x128xf32>
      tpu.vector_store %arg6[%c0_14, %c0_15], %15 {strides = array<i32>} : memref<64x128xf32, #tpu.memory_space<vmem>>, vector<64x128xf32>,
    } else {
    }
    return
  }
  func.func @transform_0(%arg0: i32, %arg1: i32, %arg2: i32) -> (i32, i32) {
    %c0_i32 = arith.constant 0 : i32
    return %arg0, %arg2 : i32, i32
  }
  func.func @transform_1(%arg0: i32, %arg1: i32, %arg2: i32) -> (i32, i32) {
    %c0_i32 = arith.constant 0 : i32
    return %arg2, %arg1 : i32, i32
  }
  func.func @transform_2(%arg0: i32, %arg1: i32, %arg2: i32) -> (i32, i32) {
    %c0_i32 = arith.constant 0 : i32
    %c0_i32_0 = arith.constant 0 : i32
    return %c0_i32, %arg1 : i32, i32
  }
  func.func @transform_3(%arg0: i32, %arg1: i32, %arg2: i32) -> (i32, i32) {
    %c0_i32 = arith.constant 0 : i32
    return %arg0, %arg1 : i32, i32
  }
}

</mosaic_0001>

<bundles_post_ra>
// kernel: tpu_custom_call.1
= control target key start
LH: loop header
LB: loop body
LE: loop exit
PB: predicated region body
PF: predicated region fallthrough
CT: control target
= control target key end

     0   :  { %8 = vsyncpa [#allocation4], 0  ;;  %s377_s0 = inlined_call_operand.hbm [shape: f32[64,128], index: 0, kind: input, shape index: {}]   ;;  %s378_s1 = inlined_call_operand.hbm [shape: f32[128,128], index: 1, kind: input, shape index: {}]   ;;  %s379_s2 = inlined_call_operand.vmem [shape: f32[1,128], index: 2, kind: input, shape index: {}]   ;;  %s380_s3 = inlined_call_operand.hbm [shape: f32[64,128], index: 3, kind: output, shape index: {}]  }
   0x1   :  { %9 = vsyncpa [#allocation7], 0 }
   0x2   :  { %10 = vsyncpa [#allocation5], 0  ;;  %s15_s14 = sshll.u32 %s377_s0, 4  ;;  %s331_s15 = smov [#allocation3]   ;;  %s16_s14 = int_to_ptr.hbm [resolvable:$true] %s15_s14 }
   0x3   :  { %s17_s16 = sshll.u32 %s331_s15, 4  ;;  %s28_s19 = sshll.u32 %s378_s1, 4  ;;  %s18_s16 = int_to_ptr.vmem [resolvable:$true] %s17_s16  ;;  %s29_s19 = int_to_ptr.hbm [resolvable:$true] %s28_s19 }
   0x4   :  { %s332_s20 = smov 128   ;;  %s333_s21 = smov 8  }
   0x5   :  { %23 = dma.hbm_to_vmem [thread:$0]  %s16_s14, 1024, %s18_s16, [#allocation4], %s332_s20, %s332_s20, %s333_s21  }
   0x6   :  { %s334_s22 = smov [#allocation6]  }
   0x7   :  { %s30_s23 = sshll.u32 %s334_s22, 4  ;;  %s31_s23 = int_to_ptr.vmem [resolvable:$true] %s30_s23 }
   0x8   :  { %36 = dma.hbm_to_vmem [thread:$0]  %s29_s19, 2048, %s31_s23, [#allocation7], %s332_s20, %s332_s20, %s333_s21  }
   0x9   :  { %325 = dma.done.wait [#allocation4], 1024  }
   0xa   :  { %326 = vsyncadd [#allocation4], 4294966272 }
   0xb   :  { %327 = dma.done.wait [#allocation7], 2048  }
   0xc   :  { %328 = vsyncadd [#allocation7], 4294965248  ;;  %v90_v0 = vld [vmem:[#allocation6 + $0x78] sm:$0xff]  ;;  %v89_v1 = vld [vmem:[#allocation6 + $0x70] sm:$0xff]  ;;  %s335_s24 = smov [#allocation8]   ;;  %s185_s27 = sshll.u32 %s380_s3, 4  ;;  %s186_s27 = int_to_ptr.hbm [resolvable:$true] %s185_s27 }
   0xd   :  { %200 = vmatpush.msra.mxu2 %v90_v0  ;;  %201 = vmatpush.msra.mxu3 %v90_v0  ;;  %v88_v2 = vld [vmem:[#allocation6 + $0x68] sm:$0xff]  ;;  %v87_v3 = vld [vmem:[#allocation6 + $0x60] sm:$0xff]  ;;  %v86_v4 = vld [vmem:[#allocation6 + $0x58] sm:$0xff]  ;;  %s183_s25 = sshll.u32 %s335_s24, 4  ;;  %s184_s25 = int_to_ptr.vmem [resolvable:$true] %s183_s25 }
   0xe   :  { %91 = vmatpush.msra.mxu0 %v90_v0  ;;  %199 = vmatpush.msra.mxu1 %v90_v0  ;;  %v85_v5 = vld [vmem:[#allocation6 + $0x50] sm:$0xff]  ;;  %v84_v6 = vld [vmem:[#allocation6 + $0x48] sm:$0xff]  ;;  %v83_v7 = vld [vmem:[#allocation6 + $0x40] sm:$0xff] }
   0xf   :  { %203 = vmatpush.msra.mxu2 %v89_v1  ;;  %204 = vmatpush.msra.mxu3 %v89_v1  ;;  %v82_v8 = vld [vmem:[#allocation6 + $0x38] sm:$0xff]  ;;  %v81_v9 = vld [vmem:[#allocation6 + $0x30] sm:$0xff]  ;;  %v80_v10 = vld [vmem:[#allocation6 + $0x28] sm:$0xff] }
  0x10   :  { %92 = vmatpush.msra.mxu0 %v89_v1  ;;  %202 = vmatpush.msra.mxu1 %v89_v1  ;;  %v79_v11 = vld [vmem:[#allocation6 + $0x20] sm:$0xff]  ;;  %v78_v12 = vld [vmem:[#allocation6 + $0x18] sm:$0xff]  ;;  %v77_v13 = vld [vmem:[#allocation6 + $0x10] sm:$0xff] }
  0x11   :  { %206 = vmatpush.msra.mxu2 %v88_v2  ;;  %207 = vmatpush.msra.mxu3 %v88_v2  ;;  %v76_v14 = vld [vmem:[#allocation6 + $0x8] sm:$0xff]  ;;  %v75_v15 = vld [vmem:[#allocation6] sm:$0xff]  ;;  %v73_v17 = vld [vmem:[#allocation3 + $0x30] sm:$0xff] }
  0x12   :  { %93 = vmatpush.msra.mxu0 %v88_v2  ;;  %205 = vmatpush.msra.mxu1 %v88_v2  ;;  %v71_v16 = vld [vmem:[#allocation3 + $0x20] sm:$0xff]  ;;  %v69_v19 = vld [vmem:[#allocation3 + $0x10] sm:$0xff]  ;;  %v72_v20 = vld [vmem:[#allocation3 + $0x28] sm:$0xff] }
  0x13   :  { %209 = vmatpush.msra.mxu2 %v87_v3  ;;  %210 = vmatpush.msra.mxu3 %v87_v3  ;;  %v67_v18 = vld [vmem:[#allocation3] sm:$0xff]  ;;  %v74_v21 = vld [vmem:[#allocation3 + $0x38] sm:$0xff]  ;;  %v68_v22 = vld [vmem:[#allocation3 + $0x8] sm:$0xff] }
  0x14   :  { %94 = vmatpush.msra.mxu0 %v87_v3  ;;  %208 = vmatpush.msra.mxu1 %v87_v3  ;;  %v70_v23 = vld [vmem:[#allocation3 + $0x18] sm:$0xff]  ;;  %v252_v24 = vld [vmem:[%s379_s2] ss:$0 sm:$0xff] }
  0x15   :  { %212 = vmatpush.msra.mxu2 %v86_v4  ;;  %213 = vmatpush.msra.mxu3 %v86_v4 }
  0x16   :  { %95 = vmatpush.msra.mxu0 %v86_v4  ;;  %211 = vmatpush.msra.mxu1 %v86_v4 }
  0x17   :  { %215 = vmatpush.msra.mxu2 %v85_v5  ;;  %216 = vmatpush.msra.mxu3 %v85_v5 }
  0x18   :  { %96 = vmatpush.msra.mxu0 %v85_v5  ;;  %214 = vmatpush.msra.mxu1 %v85_v5 }
  0x19   :  { %218 = vmatpush.msra.mxu2 %v84_v6  ;;  %219 = vmatpush.msra.mxu3 %v84_v6 }
  0x1a   :  { %97 = vmatpush.msra.mxu0 %v84_v6  ;;  %217 = vmatpush.msra.mxu1 %v84_v6 }
  0x1b   :  { %221 = vmatpush.msra.mxu2 %v83_v7  ;;  %222 = vmatpush.msra.mxu3 %v83_v7 }
  0x1c   :  { %98 = vmatpush.msra.mxu0 %v83_v7  ;;  %220 = vmatpush.msra.mxu1 %v83_v7 }
  0x1d   :  { %224 = vmatpush.msra.mxu2 %v82_v8  ;;  %225 = vmatpush.msra.mxu3 %v82_v8 }
  0x1e   :  { %99 = vmatpush.msra.mxu0 %v82_v8  ;;  %223 = vmatpush.msra.mxu1 %v82_v8 }
  0x1f   :  { %227 = vmatpush.msra.mxu2 %v81_v9  ;;  %228 = vmatpush.msra.mxu3 %v81_v9 }
  0x20   :  { %100 = vmatpush.msra.mxu0 %v81_v9  ;;  %226 = vmatpush.msra.mxu1 %v81_v9 }
  0x21   :  { %230 = vmatpush.msra.mxu2 %v80_v10  ;;  %231 = vmatpush.msra.mxu3 %v80_v10 }
  0x22   :  { %101 = vmatpush.msra.mxu0 %v80_v10  ;;  %229 = vmatpush.msra.mxu1 %v80_v10 }
  0x23   :  { %233 = vmatpush.msra.mxu2 %v79_v11  ;;  %234 = vmatpush.msra.mxu3 %v79_v11 }
  0x24   :  { %102 = vmatpush.msra.mxu0 %v79_v11  ;;  %232 = vmatpush.msra.mxu1 %v79_v11 }
  0x25   :  { %236 = vmatpush.msra.mxu2 %v78_v12  ;;  %237 = vmatpush.msra.mxu3 %v78_v12 }
  0x26   :  { %103 = vmatpush.msra.mxu0 %v78_v12  ;;  %235 = vmatpush.msra.mxu1 %v78_v12 }
  0x27   :  { %239 = vmatpush.msra.mxu2 %v77_v13  ;;  %240 = vmatpush.msra.mxu3 %v77_v13 }
  0x28   :  { %104 = vmatpush.msra.mxu0 %v77_v13  ;;  %238 = vmatpush.msra.mxu1 %v77_v13 }
  0x29   :  { %242 = vmatpush.msra.mxu2 %v76_v14  ;;  %243 = vmatpush.msra.mxu3 %v76_v14 }
  0x2a   :  { %105 = vmatpush.msra.mxu0 %v76_v14  ;;  %241 = vmatpush.msra.mxu1 %v76_v14 }
  0x2b   :  { %245 = vmatpush.msra.mxu2 %v75_v15  ;;  %246 = vmatpush.msra.mxu3 %v75_v15 }
  0x2c   :  { %119 = vmatmul.f32.vlgmr.msra.gmra.mxu2 %v71_v16  ;;  %125 = vmatmul.f32.vlgmr.msra.gmra.mxu3 %v73_v17 }
  0x2d   :  { %106 = vmatpush.msra.mxu0 %v75_v15  ;;  %244 = vmatpush.msra.mxu1 %v75_v15 }
  0x2e   :  { %107 = vmatmul.f32.vlgmr.msra.gmra.mxu0 %v67_v18  ;;  %113 = vmatmul.f32.vlgmr.msra.gmra.mxu1 %v69_v19 }
  0x34   :  { %122 = vmatmul.f32.gmra.mxu2 %v72_v20  ;;  %128 = vmatmul.f32.gmra.mxu3 %v74_v21 }
  0x36   :  { %110 = vmatmul.f32.gmra.mxu0 %v68_v22  ;;  %116 = vmatmul.f32.gmra.mxu1 %v70_v23 }
  0xab   :  { %v108_v25 = vpop.f32.mrf.mxu0  ;;  %v114_v26 = vpop.f32.mrf.mxu1 }
  0xac   :  { %v163_v27 = vadd.f32 %v252_v24, %v108_v25  ;;  %v165_v28 = vadd.f32 %v252_v24, %v114_v26 }
  0xae   :  { %171 = vst [vmem:[#allocation8] sm:$0xff] %v163_v27 }
  0xaf   :  { %173 = vst [vmem:[#allocation8 + $0x10] sm:$0xff] %v165_v28  ;;  %v120_v29 = vpop.f32.mrf.mxu2  ;;  %v126_v30 = vpop.f32.mrf.mxu3 }
  0xb0   :  { %v167_v31 = vadd.f32 %v252_v24, %v120_v29  ;;  %v169_v32 = vadd.f32 %v252_v24, %v126_v30 }
  0xb2   :  { %175 = vst [vmem:[#allocation8 + $0x20] sm:$0xff] %v167_v31 }
  0xb3   :  { %177 = vst [vmem:[#allocation8 + $0x30] sm:$0xff] %v169_v32  ;;  %v111_v33 = vpop.f32.mrf.mxu0  ;;  %v117_v34 = vpop.f32.mrf.mxu1 }
  0xb4   :  { %v164_v35 = vadd.f32 %v252_v24, %v111_v33  ;;  %v166_v36 = vadd.f32 %v252_v24, %v117_v34 }
  0xb6   :  { %172 = vst [vmem:[#allocation8 + $0x8] sm:$0xff] %v164_v35 }
  0xb7   :  { %174 = vst [vmem:[#allocation8 + $0x18] sm:$0xff] %v166_v36  ;;  %v123_v37 = vpop.f32.mrf.mxu2  ;;  %v129_v38 = vpop.f32.mrf.mxu3 }
  0xb8   :  { %v168_v39 = vadd.f32 %v252_v24, %v123_v37  ;;  %v170_v40 = vadd.f32 %v252_v24, %v129_v38 }
  0xba   :  { %176 = vst [vmem:[#allocation8 + $0x28] sm:$0xff] %v168_v39 }
  0xbb   :  { %178 = vst [vmem:[#allocation8 + $0x38] sm:$0xff] %v170_v40 }
  0xbc   :  { %191 = dma.vmem_to_hbm [thread:$0]  %s184_s25, 1024, %s186_s27, [#allocation5], %s332_s20, %s332_s20, %s333_s21  }
  0xbd   :  { %329 = dma.done.wait [#allocation5], 1024  }
  0xbe   :  { %330 = vsyncadd [#allocation5], 4294966272 }
  0xbf   :  { %196 = vsyncpa [#allocation4], 1 }
  0xc0   :  { %197 = vsyncpa [#allocation7], 1 }
  0xc1   :  { %198 = vsyncpa [#allocation5], 1 }

</bundles_post_ra>
